<compile_context>
chip_gen: v6e
topology: v6e:2x2x1
jax: 0.10.0
libtpu: 0.0.40
codegen_flags: <defaults>
</compile_context>

<pallas_src>
import jax
import jax.numpy as jnp
from jax import lax
from jax.experimental import pallas as pl
from jax.experimental.pallas import tpu as pltpu


def _vnet_kernel(x_ref, w1_ref, b1_ref, w2t_ref, b2_ref, ot_ref):
    # x_ref: [TB, F_in] tile in natural layout (streamed, double-buffered).
    # In-kernel cast to the compute dtype (no-op on the f32 path); doing it here
    # avoids an extra host-side HBM pass over x.
    x = x_ref[...].astype(w1_ref.dtype)

    # h^T = relu(W1 @ x^T + b1) -> [H, TB]: contract the shared F_in (lane) dim of
    # both operands (q @ k^T MXU pattern), so the batch lands on the lane axis
    # without any explicit transpose of x.
    h = lax.dot_general(
        w1_ref[...], x,
        dimension_numbers=(((1,), (1,)), ((), ())),
        preferred_element_type=jnp.float32)
    h = jnp.maximum(h + b1_ref[...], 0.0)  # bias/ReLU in f32 (v5e VPU has no bf16)

    # Second layer: out^T = sigmoid(W2 @ h^T + b2) -> [F_out, TB] (lane-dense).
    f_out = w2t_ref.shape[1]
    if f_out == 1:
        # VPU multiply + sublane reduce; skips a <1%-utilization M=1 MXU matmul
        # and the per-step cast of the [H, TB] block.
        z = jnp.sum(w2t_ref[...].astype(jnp.float32) * h, axis=0, keepdims=True)
    else:
        z = lax.dot_general(
            w2t_ref[...].astype(jnp.float32), h,
            dimension_numbers=(((0,), (0,)), ((), ())),
            preferred_element_type=jnp.float32)
    z = z + b2_ref[...]
    ot_ref[...] = jax.nn.sigmoid(z).astype(ot_ref.dtype)


def vnet_forward(x, w1, b1, w2, b2, *, tb_max=32768, compute_dtype=jnp.float32,
                 core_parallel=False, vmem_limit_bytes=None):
    """VNet forward.

    x:  [B, F_in]   (same layout as the PyTorch module input)
    w1: [H, F_in]   (PyTorch nn.Linear weight layout, [out, in])
    b1: [H]
    w2: [F_out, H]
    b2: [F_out]
    Returns [B, F_out] float32.
    """
    B, f_in = x.shape
    h_dim = w1.shape[0]
    f_out = w2.shape[0]

    # Batch tile: big enough to amortize the ~0.35us/grid-step overhead, but never
    # larger than the 128-rounded batch.  Always a multiple of 128 (lane rule).
    bp128 = ((B + 127) // 128) * 128
    tb = max(128, (min(int(tb_max), bp128) // 128) * 128)
    grid = pl.cdiv(bp128, tb)
    total = grid * tb

    # Pad batch rows only if needed (no-op when B is already a tile multiple);
    # padded rows produce garbage outputs that are sliced off below.
    x_in = x if total == B else jnp.pad(x, ((0, total - B), (0, 0)))

    # Weights/biases are tiny; casting them host-side is negligible.  x is NOT
    # cast or transposed on the host (both handled inside the kernel).
    w1c = w1.astype(compute_dtype)                    # [H, F_in]
    w2t = w2.T.astype(compute_dtype)                  # [H, F_out]
    b1c = b1.reshape(h_dim, 1).astype(jnp.float32)
    b2c = b2.reshape(f_out, 1).astype(jnp.float32)

    x_bytes = int(jnp.dtype(x.dtype).itemsize)
    w_bytes = int(jnp.dtype(compute_dtype).itemsize)
    cost = pl.CostEstimate(
        flops=2 * total * (f_in * h_dim + h_dim * f_out),
        transcendentals=total * f_out,                 # sigmoid
        bytes_accessed=(total * f_in * x_bytes         # x stream (dominant)
                        + (f_in * h_dim + h_dim * f_out) * w_bytes
                        + (h_dim + f_out) * 4
                        + total * f_out * 4),          # output stream
    )

    # "parallel" is portable; CORE_PARALLEL actually shards the batch grid across
    # the 2 TensorCores on v7x (up to ~2x on this HBM-bound kernel).
    batch_sem = pltpu.CORE_PARALLEL if core_parallel else "parallel"

    out_t = pl.pallas_call(
        _vnet_kernel,
        out_shape=jax.ShapeDtypeStruct((f_out, total), jnp.float32),
        grid=(grid,),
        in_specs=[
            # x streamed per grid step (double-buffered by BlockSpec), natural layout.
            pl.BlockSpec((tb, f_in), lambda i: (i, 0)),
            # weights/biases: same block every step -> VMEM-resident, DMA'd once.
            pl.BlockSpec((h_dim, f_in), lambda i: (0, 0)),
            pl.BlockSpec((h_dim, 1), lambda i: (0, 0)),
            pl.BlockSpec((h_dim, f_out), lambda i: (0, 0)),
            pl.BlockSpec((f_out, 1), lambda i: (0, 0)),
        ],
        out_specs=pl.BlockSpec((f_out, tb), lambda i: (0, i)),   # lane-dense stores
        compiler_params=pltpu.CompilerParams(
            dimension_semantics=(batch_sem,),
            vmem_limit_bytes=vmem_limit_bytes,
        ),
        cost_estimate=cost,
    )(x_in, w1c, b1c, w2t, b2c)

    return out_t[:, :B].T  # [B, F_out]; touches only B*F_out*4 bytes


def init_vnet_params(key, f_in, hidden, f_out):
    """Deterministic init mimicking torch.nn.Linear default (uniform +/- 1/sqrt(fan_in)).

    Weights stay in the PyTorch [out, in] layout.
    """
    k1, k2, k3, k4 = jax.random.split(key, 4)
    bound1 = 1.0 / jnp.sqrt(jnp.float32(f_in))
    bound2 = 1.0 / jnp.sqrt(jnp.float32(hidden))
    w1 = jax.random.uniform(k1, (hidden, f_in), jnp.float32, -bound1, bound1)
    b1 = jax.random.uniform(k2, (hidden,), jnp.float32, -bound1, bound1)
    w2 = jax.random.uniform(k3, (f_out, hidden), jnp.float32, -bound2, bound2)
    b2 = jax.random.uniform(k4, (f_out,), jnp.float32, -bound2, bound2)
    return w1, b1, w2, b2


if __name__ == "__main__":
    key = jax.random.PRNGKey(0)
    kx, kx2, kp = jax.random.split(key, 3)

    # Small shapes consistent with the module; B=256 -> one 256-row grid step.
    B, F_IN, HIDDEN, F_OUT = 256, 16, 32, 1
    x = jax.random.normal(kx, (B, F_IN), jnp.float32)
    w1, b1, w2, b2 = init_vnet_params(kp, F_IN, HIDDEN, F_OUT)

    # Pure-JAX reference of the same forward semantics (PyTorch F.linear layout).
    ref = jax.nn.sigmoid(jnp.maximum(x @ w1.T + b1, 0.0) @ w2.T + b2)

    # f32 path: exact check.
    out = jax.block_until_ready(vnet_forward(x, w1, b1, w2, b2))
    assert out.shape == (B, F_OUT)
    assert jnp.allclose(out, ref, atol=1e-5, rtol=1e-5)

    # bf16 MXU path (v6e/v7x perf configuration): looser tolerance (x quantized too).
    out_bf16 = jax.block_until_ready(
        vnet_forward(x, w1, b1, w2, b2, compute_dtype=jnp.bfloat16))
    assert jnp.allclose(out_bf16, ref, atol=3e-2, rtol=0.0)

    # Ragged batch + multi-step grid path (exercises padding, grid>1, slicing).
    B2 = 200
    x2 = jax.random.normal(kx2, (B2, F_IN), jnp.float32)
    ref2 = jax.nn.sigmoid(jnp.maximum(x2 @ w1.T + b1, 0.0) @ w2.T + b2)
    out2 = jax.block_until_ready(vnet_forward(x2, w1, b1, w2, b2, tb_max=128))
    assert out2.shape == (B2, F_OUT)
    assert jnp.allclose(out2, ref2, atol=1e-5, rtol=1e-5)

    # TODO(synk): fp8 weight residency on v7x and CORE_PARALLEL dual-TC sharding are
    # exposed via flags but not exercised here (demo must run on any TPU generation).
    print("KERNEL_OK")
</pallas_src>

<mosaic_0001>
module attributes {stable_mosaic.version = 11 : i64} {
  func.func @_vnet_kernel(%arg0: i32, %arg1: memref<256x16xf32, #tpu.memory_space<vmem>>, %arg2: memref<32x16xf32, #tpu.memory_space<vmem>>, %arg3: memref<32x1xf32, #tpu.memory_space<vmem>>, %arg4: memref<32x1xf32, #tpu.memory_space<vmem>>, %arg5: memref<1x1xf32, #tpu.memory_space<vmem>>, %arg6: memref<1x256xf32, #tpu.memory_space<vmem>>) attributes {dimension_semantics = [#tpu.dimension_semantics<parallel>], iteration_bounds = array<i64: 1>, scalar_prefetch = 0 : i64, scratch_operands = 0 : i64, tpu.core_type = #tpu.core_type<tc>, window_params = [{transform_indices = @transform_0, window_bounds = array<i64: 256, 16>}, {pipeline_mode = #tpu.pipeline_mode<synchronous>, transform_indices = @transform_1, window_bounds = array<i64: 32, 16>}, {pipeline_mode = #tpu.pipeline_mode<synchronous>, transform_indices = @transform_2, window_bounds = array<i64: 32, 1>}, {pipeline_mode = #tpu.pipeline_mode<synchronous>, transform_indices = @transform_3, window_bounds = array<i64: 32, 1>}, {pipeline_mode = #tpu.pipeline_mode<synchronous>, transform_indices = @transform_4, window_bounds = array<i64: 1, 1>}, {transform_indices = @transform_5, window_bounds = array<i64: 1, 256>}]} {
    %c0 = arith.constant 0 : index
    %c0_0 = arith.constant 0 : index
    %0 = vector.load %arg1[%c0, %c0_0] : memref<256x16xf32, #tpu.memory_space<vmem>>, vector<256x16xf32>
    %c0_1 = arith.constant 0 : index
    %c0_2 = arith.constant 0 : index
    %1 = vector.load %arg2[%c0_1, %c0_2] : memref<32x16xf32, #tpu.memory_space<vmem>>, vector<32x16xf32>
    %cst = arith.constant dense<0.000000e+00> : vector<32x256xf32>
    %2 = tpu.matmul %1, %0, %cst {dimension_numbers = #tpu.dot_dimension_numbers<[1], [1], [0], [0], [0, 0, 1, 0], [], []>} : vector<32x16xf32>, vector<256x16xf32>, vector<32x256xf32> -> vector<32x256xf32>
    %c0_3 = arith.constant 0 : index
    %c0_4 = arith.constant 0 : index
    %3 = vector.load %arg3[%c0_3, %c0_4] : memref<32x1xf32, #tpu.memory_space<vmem>>, vector<32x1xf32>
    %4 = vector.broadcast %3 : vector<32x1xf32> to vector<32x256xf32>
    %5 = arith.addf %2, %4 : vector<32x256xf32>
    %cst_5 = arith.constant 0.000000e+00 : f32
    %6 = vector.broadcast %cst_5 : f32 to vector<32x256xf32>
    %7 = arith.maximumf %5, %6 : vector<32x256xf32>
    %c0_6 = arith.constant 0 : index
    %c0_7 = arith.constant 0 : index
    %8 = vector.load %arg4[%c0_6, %c0_7] : memref<32x1xf32, #tpu.memory_space<vmem>>, vector<32x1xf32>
    %9 = vector.broadcast %8 : vector<32x1xf32> to vector<32x256xf32>
    %10 = arith.mulf %9, %7 : vector<32x256xf32>
    %cst_8 = arith.constant dense<0.000000e+00> : vector<256xf32>
    %11 = vector.multi_reduction <add>, %10, %cst_8 [0] : vector<32x256xf32> to vector<256xf32>
    %12 = vector.shape_cast %11 : vector<256xf32> to vector<1x256xf32>
    %c0_9 = arith.constant 0 : index
    %c0_10 = arith.constant 0 : index
    %13 = vector.load %arg5[%c0_9, %c0_10] : memref<1x1xf32, #tpu.memory_space<vmem>>, vector<1x1xf32>
    %14 = vector.broadcast %13 : vector<1x1xf32> to vector<1x256xf32>
    %15 = arith.addf %12, %14 : vector<1x256xf32>
    %16 = arith.negf %15 : vector<1x256xf32>
    %17 = math.exp %16 : vector<1x256xf32>
    %cst_11 = arith.constant 1.000000e+00 : f32
    %18 = vector.broadcast %cst_11 : f32 to vector<1x256xf32>
    %19 = arith.addf %18, %17 : vector<1x256xf32>
    %20 = arith.divf %18, %19 : vector<1x256xf32>
    %c0_12 = arith.constant 0 : index
    %c0_13 = arith.constant 0 : index
    %21 = vector.load %arg6[%c0_12, %c0_13] : memref<1x256xf32, #tpu.memory_space<vmem>>, vector<1x256xf32>
    tpu.vector_store %arg6[%c0_12, %c0_13], %20 {strides = array<i32>} : memref<1x256xf32, #tpu.memory_space<vmem>>, vector<1x256xf32>,
    return
  }
  func.func @transform_0(%arg0: i32) -> (i32, i32) {
    %c0_i32 = arith.constant 0 : i32
    %c0_i32_0 = arith.constant 0 : i32
    return %arg0, %c0_i32 : i32, i32
  }
  func.func @transform_1(%arg0: i32) -> (i32, i32) {
    %c0_i32 = arith.constant 0 : i32
    %c0_i32_0 = arith.constant 0 : i32
    %c0_i32_1 = arith.constant 0 : i32
    return %c0_i32, %c0_i32_0 : i32, i32
  }
  func.func @transform_2(%arg0: i32) -> (i32, i32) {
    %c0_i32 = arith.constant 0 : i32
    %c0_i32_0 = arith.constant 0 : i32
    %c0_i32_1 = arith.constant 0 : i32
    return %c0_i32, %c0_i32_0 : i32, i32
  }
  func.func @transform_3(%arg0: i32) -> (i32, i32) {
    %c0_i32 = arith.constant 0 : i32
    %c0_i32_0 = arith.constant 0 : i32
    %c0_i32_1 = arith.constant 0 : i32
    return %c0_i32, %c0_i32_0 : i32, i32
  }
  func.func @transform_4(%arg0: i32) -> (i32, i32) {
    %c0_i32 = arith.constant 0 : i32
    %c0_i32_0 = arith.constant 0 : i32
    %c0_i32_1 = arith.constant 0 : i32
    return %c0_i32, %c0_i32_0 : i32, i32
  }
  func.func @transform_5(%arg0: i32) -> (i32, i32) {
    %c0_i32 = arith.constant 0 : i32
    %c0_i32_0 = arith.constant 0 : i32
    return %c0_i32, %arg0 : i32, i32
  }
}

</mosaic_0001>

<bundles_post_ra>
// kernel: tpu_custom_call.1
= control target key start
LH: loop header
LB: loop body
LE: loop exit
PB: predicated region body
PF: predicated region fallthrough
CT: control target
= control target key end

     0   :  { %s796_s0 = inlined_call_operand.vmem [shape: f32[256,16], index: 0, kind: input, shape index: {}]   ;;  %s797_s1 = inlined_call_operand.vmem [shape: f32[32,16], index: 1, kind: input, shape index: {}]   ;;  %s798_s2 = inlined_call_operand.vmem [shape: f32[32,1], index: 2, kind: input, shape index: {}]   ;;  %s799_s3 = inlined_call_operand.vmem [shape: f32[32,1], index: 3, kind: input, shape index: {}]   ;;  %s800_s4 = inlined_call_operand.<no memory space> [shape: f32[1,1], index: 4, kind: input, shape index: {}]   ;;  %s801_s5 = inlined_call_operand.hbm [shape: f32[1,256], index: 5, kind: output, shape index: {}]  }
   0x1   :  { %v10_v0 = vstv %s800_s4 }
   0x2   :  { %11 = vst [vmem:[#allocation2] sm:$0x1] %v10_v0 }
   0x3   :  { %v54_v1 = vld [vmem:[%s796_s0 + $0xf8] sm:$0xff]  ;;  %vm83_vm0 = vcmask 130048   ;;  %v53_v3 = vld [vmem:[%s796_s0 + $0xf0] sm:$0xff]  ;;  %v52_v5 = vld [vmem:[%s796_s0 + $0xe8] sm:$0xff]  ;;  %v545_v6 = vmov 0  }
   0x4   :  { %v38_v2 = vld [vmem:[%s796_s0 + $0x78] sm:$0xff]  ;;  %438 = vmatprep.subr.msk.mxu0 %vm83_vm0, %v54_v1  ;;  %478 = vmatprep.subr.msk.mxu1 %vm83_vm0, %v54_v1  ;;  %v37_v4 = vld [vmem:[%s796_s0 + $0x70] sm:$0xff]  ;;  %v36_v7 = vld [vmem:[%s796_s0 + $0x68] sm:$0xff] }
   0x5   :  { %439 = vmatpush3.xpose.msk.msra.mxu0 %vm83_vm0, %v38_v2  ;;  %494 = vmatpush3.xpose.msk.msra.mxu1 %vm83_vm0, %v38_v2  ;;  %v51_v8 = vld [vmem:[%s796_s0 + $0xe0] sm:$0xff]  ;;  %v627_v11 = vld [vmem:[%s797_s1 + $0x10] sm:$0xff]  ;;  %v50_v12 = vld [vmem:[%s796_s0 + $0xd8] sm:$0xff] }
   0x6   :  { %440 = vmatprep.subr.msk.mxu0 %vm83_vm0, %v53_v3  ;;  %479 = vmatprep.subr.msk.mxu1 %vm83_vm0, %v53_v3  ;;  %v617_v9 = vld [vmem:[%s797_s1] sm:$0xff]  ;;  %v61_v14 = vld [vmem:[%s798_s2 + $0x10] sm:$0xff]  ;;  %v60_v15 = vld [vmem:[%s798_s2 + $0x8] sm:$0xff] }
   0x7   :  { %513 = vset.pattern.permute.xlu0 %v545_v6  ;;  %514 = vset.pattern.permute.xlu1 %v545_v6  ;;  %v35_v10 = vld [vmem:[%s796_s0 + $0x60] sm:$0xff]  ;;  %v62_v16 = vld [vmem:[%s798_s2 + $0x18] sm:$0xff] }
   0x8   :  { %470 = vmatprep.mubr.msk.f32.mxu0 %vm83_vm0, %v617_v9  ;;  %474 = vmatprep.mubr.msk.f32.mxu1 %vm83_vm0, %v627_v11  ;;  %v59_v13 = vld [vmem:[%s798_s2] sm:$0xff]  ;;  %v34_v17 = vld [vmem:[%s796_s0 + $0x58] sm:$0xff] }
   0x9   :  { %441 = vmatpush3.xpose.msk.msra.mxu0 %vm83_vm0, %v37_v4  ;;  %495 = vmatpush3.xpose.msk.msra.mxu1 %vm83_vm0, %v37_v4 }
   0xa   :  { %442 = vmatprep.subr.msk.mxu0 %vm83_vm0, %v52_v5  ;;  %480 = vmatprep.subr.msk.mxu1 %vm83_vm0, %v52_v5 }
   0xb   :  { %65 = vperm.xlu0 %513, %v59_v13   ;;  %75 = vperm.xlu1 %514, %v61_v14  }
   0xd   :  { %443 = vmatpush3.xpose.msk.msra.mxu0 %vm83_vm0, %v36_v7  ;;  %496 = vmatpush3.xpose.msk.msra.mxu1 %vm83_vm0, %v36_v7 }
   0xe   :  { %444 = vmatprep.subr.msk.mxu0 %vm83_vm0, %v51_v8  ;;  %481 = vmatprep.subr.msk.mxu1 %vm83_vm0, %v51_v8 }
  0x11   :  { %445 = vmatpush3.xpose.msk.msra.mxu0 %vm83_vm0, %v35_v10  ;;  %497 = vmatpush3.xpose.msk.msra.mxu1 %vm83_vm0, %v35_v10 }
  0x12   :  { %446 = vmatprep.subr.msk.mxu0 %vm83_vm0, %v50_v12  ;;  %482 = vmatprep.subr.msk.mxu1 %vm83_vm0, %v50_v12 }
  0x13   :  { %12 = vsyncpa [#allocation4], 0  ;;  %v49_v18 = vld [vmem:[%s796_s0 + $0xd0] sm:$0xff]  ;;  %70 = vperm.xlu0 %513, %v60_v15   ;;  %80 = vperm.xlu1 %514, %v62_v16   ;;  %v289_v19 = vld [vmem:[%s799_s3] sm:$0xff] }
  0x14   :  { %v290_v20 = vld [vmem:[%s799_s3 + $0x8] sm:$0xff]  ;;  %v33_v21 = vld [vmem:[%s796_s0 + $0x50] sm:$0xff]  ;;  %v292_v24 = vld [vmem:[%s799_s3 + $0x18] sm:$0xff] }
  0x15   :  { %447 = vmatpush3.xpose.msk.msra.mxu0 %vm83_vm0, %v34_v17  ;;  %498 = vmatpush3.xpose.msk.msra.mxu1 %vm83_vm0, %v34_v17  ;;  %v48_v22 = vld [vmem:[%s796_s0 + $0xc8] sm:$0xff]  ;;  %v291_v23 = vld [vmem:[%s799_s3 + $0x10] sm:$0xff]  ;;  %v47_v26 = vld [vmem:[%s796_s0 + $0xc0] sm:$0xff] }
  0x16   :  { %448 = vmatprep.subr.msk.mxu0 %vm83_vm0, %v49_v18  ;;  %483 = vmatprep.subr.msk.mxu1 %vm83_vm0, %v49_v18  ;;  %v32_v25 = vld [vmem:[%s796_s0 + $0x48] sm:$0xff]  ;;  %v339_v27 = vld [vmem:[#allocation2] sm:$0x1]  ;;  %v46_v29 = vld [vmem:[%s796_s0 + $0xb8] sm:$0xff] }
  0x17   :  { %295 = vperm.xlu0 %513, %v289_v19   ;;  %300 = vperm.xlu1 %514, %v290_v20   ;;  %v31_v28 = vld [vmem:[%s796_s0 + $0x40] sm:$0xff]  ;;  %v30_v30 = vld [vmem:[%s796_s0 + $0x38] sm:$0xff]  ;;  %v45_v31 = vld [vmem:[%s796_s0 + $0xb0] sm:$0xff] }
  0x18   :  { %v29_v32 = vld [vmem:[%s796_s0 + $0x30] sm:$0xff]  ;;  %v44_v33 = vld [vmem:[%s796_s0 + $0xa8] sm:$0xff]  ;;  %v43_v35 = vld [vmem:[%s796_s0 + $0xa0] sm:$0xff] }
  0x19   :  { %449 = vmatpush3.xpose.msk.msra.mxu0 %vm83_vm0, %v33_v21  ;;  %499 = vmatpush3.xpose.msk.msra.mxu1 %vm83_vm0, %v33_v21  ;;  %v28_v34 = vld [vmem:[%s796_s0 + $0x28] sm:$0xff]  ;;  %v27_v36 = vld [vmem:[%s796_s0 + $0x20] sm:$0xff]  ;;  %v42_v37 = vld [vmem:[%s796_s0 + $0x98] sm:$0xff] }
  0x1a   :  { %450 = vmatprep.subr.msk.mxu0 %vm83_vm0, %v48_v22  ;;  %484 = vmatprep.subr.msk.mxu1 %vm83_vm0, %v48_v22  ;;  %v26_v38 = vld [vmem:[%s796_s0 + $0x18] sm:$0xff]  ;;  %v41_v39 = vld [vmem:[%s796_s0 + $0x90] sm:$0xff]  ;;  %v40_v41 = vld [vmem:[%s796_s0 + $0x88] sm:$0xff] }
  0x1b   :  { %305 = vperm.xlu0 %513, %v291_v23   ;;  %310 = vperm.xlu1 %514, %v292_v24   ;;  %v25_v40 = vld [vmem:[%s796_s0 + $0x10] sm:$0xff]  ;;  %v24_v42 = vld [vmem:[%s796_s0 + $0x8] sm:$0xff]  ;;  %v39_v43 = vld [vmem:[%s796_s0 + $0x80] sm:$0xff] }
  0x1c   :  { %v23_v44 = vld [vmem:[%s796_s0] sm:$0xff]  ;;  %v56_v45 = vld [vmem:[%s797_s1 + $0x8] sm:$0xff]  ;;  %v58_v46 = vld [vmem:[%s797_s1 + $0x18] sm:$0xff]  ;;  %s547_s0 = smov [#allocation3]  }
  0x1d   :  { %451 = vmatpush3.xpose.msk.msra.mxu0 %vm83_vm0, %v32_v25  ;;  %500 = vmatpush3.xpose.msk.msra.mxu1 %vm83_vm0, %v32_v25  ;;  %s392_s1 = sshll.u32 %s547_s0, 4  ;;  %s393_s1 = int_to_ptr.vmem [resolvable:$true] %s392_s1 }
  0x1e   :  { %452 = vmatprep.subr.msk.mxu0 %vm83_vm0, %v47_v26  ;;  %485 = vmatprep.subr.msk.mxu1 %vm83_vm0, %v47_v26  ;;  %s523_s4 = scalar_lea.vmem %s393_s1, 32  ;;  %p528_p1 = scmp.lt.s32.totalorder %s393_s1, %s393_s1 }
  0x1f   :  { %342 = vperm.xlu0 %513, %v339_v27   ;;  %v345_v27 = vlaneseq  ;;  %p524_p0 = scmp.ne.s32.totalorder %s393_s1, %s523_s4  ;;  %p529_p2 = scmp.lt.s32.totalorder %s523_s4, %s523_s4 }
  0x21   :  { %453 = vmatpush3.xpose.msk.msra.mxu0 %vm83_vm0, %v31_v28  ;;  %501 = vmatpush3.xpose.msk.msra.mxu1 %vm83_vm0, %v31_v28  ;;  %vm383_vm1 = vcmp.lt.s32.totalorder %v345_v27, 256  ;;  %p530_p3 = por %p529_p2, %p528_p1 }
  0x22   :  { %454 = vmatprep.subr.msk.mxu0 %vm83_vm0, %v46_v29  ;;  %486 = vmatprep.subr.msk.mxu1 %vm83_vm0, %v46_v29 }
  0x23   :  { %p531_p4 = pnand %p530_p3, %p524_p0 }
  0x25   :  { %455 = vmatpush3.xpose.msk.msra.mxu0 %vm83_vm0, %v30_v30  ;;  %502 = vmatpush3.xpose.msk.msra.mxu1 %vm83_vm0, %v30_v30 }
  0x26   :  { %456 = vmatprep.subr.msk.mxu0 %vm83_vm0, %v45_v31  ;;  %487 = vmatprep.subr.msk.mxu1 %vm83_vm0, %v45_v31 }
  0x29   :  { %457 = vmatpush3.xpose.msk.msra.mxu0 %vm83_vm0, %v29_v32  ;;  %503 = vmatpush3.xpose.msk.msra.mxu1 %vm83_vm0, %v29_v32  ;;  %v346_v32 = vshrl.u32 %v345_v27, 7 }
  0x2a   :  { %458 = vmatprep.subr.msk.mxu0 %vm83_vm0, %v44_v33  ;;  %488 = vmatprep.subr.msk.mxu1 %vm83_vm0, %v44_v33 }
  0x2d   :  { %459 = vmatpush3.xpose.msk.msra.mxu0 %vm83_vm0, %v28_v34  ;;  %504 = vmatpush3.xpose.msk.msra.mxu1 %vm83_vm0, %v28_v34 }
  0x2e   :  { %460 = vmatprep.subr.msk.mxu0 %vm83_vm0, %v43_v35  ;;  %489 = vmatprep.subr.msk.mxu1 %vm83_vm0, %v43_v35 }
  0x31   :  { %461 = vmatpush3.xpose.msk.msra.mxu0 %vm83_vm0, %v27_v36  ;;  %505 = vmatpush3.xpose.msk.msra.mxu1 %vm83_vm0, %v27_v36 }
  0x32   :  { %462 = vmatprep.subr.msk.mxu0 %vm83_vm0, %v42_v37  ;;  %490 = vmatprep.subr.msk.mxu1 %vm83_vm0, %v42_v37  ;;  %v347_v37 = vsub.s32 0, %v346_v32 }
  0x35   :  { %463 = vmatpush3.xpose.msk.msra.mxu0 %vm83_vm0, %v26_v38  ;;  %506 = vmatpush3.xpose.msk.msra.mxu1 %vm83_vm0, %v26_v38 }
  0x36   :  { %464 = vmatprep.subr.msk.mxu0 %vm83_vm0, %v41_v39  ;;  %491 = vmatprep.subr.msk.mxu1 %vm83_vm0, %v41_v39 }
  0x39   :  { %465 = vmatpush3.xpose.msk.msra.mxu0 %vm83_vm0, %v25_v40  ;;  %507 = vmatpush3.xpose.msk.msra.mxu1 %vm83_vm0, %v25_v40 }
  0x3a   :  { %466 = vmatprep.subr.msk.mxu0 %vm83_vm0, %v40_v41  ;;  %492 = vmatprep.subr.msk.mxu1 %vm83_vm0, %v40_v41 }
  0x3d   :  { %467 = vmatpush3.xpose.msk.msra.mxu0 %vm83_vm0, %v24_v42  ;;  %508 = vmatpush3.xpose.msk.msra.mxu1 %vm83_vm0, %v24_v42 }
  0x3e   :  { %468 = vmatprep.subr.msk.mxu0 %vm83_vm0, %v39_v43  ;;  %493 = vmatprep.subr.msk.mxu1 %vm83_vm0, %v39_v43 }
  0x41   :  { %469 = vmatpush3.xpose.msk.msra.mxu0 %vm83_vm0, %v23_v44  ;;  %509 = vmatpush3.xpose.msk.msra.mxu1 %vm83_vm0, %v23_v44 }
  0x44   :  { %471 = vmatmul.mubr.msk.f32.vlgmr.msra.gmra.mxu0 %vm83_vm0, %v617_v9  ;;  %475 = vmatmul.mubr.msk.f32.vlgmr.msra.gmra.mxu1 %vm83_vm0, %v627_v11 }
  0x45   :  { %472 = vmatprep.mubr.msk.f32.mxu0 %vm83_vm0, %v56_v45  ;;  %476 = vmatprep.mubr.msk.f32.mxu1 %vm83_vm0, %v58_v46 }
  0x48   :  { %473 = vmatmul.mubr.msk.f32.gmra.mxu0 %vm83_vm0, %v56_v45  ;;  %477 = vmatmul.mubr.msk.f32.gmra.mxu1 %vm83_vm0, %v58_v46 }
  0x86   :  { %v66_v47 = vpop.permute.xlu0 %65  ;;  %v76_v48 = vpop.permute.xlu1 %75 }
  0x8e   :  { %v71_v49 = vpop.permute.xlu0 %70  ;;  %v81_v52 = vpop.permute.xlu1 %80 }
  0x92   :  { %v296_v60 = vpop.permute.xlu0 %295  ;;  %v301_v3 = vpop.permute.xlu1 %300 }
  0x96   :  { %v306_v14 = vpop.permute.xlu0 %305  ;;  %v311_v20 = vpop.permute.xlu1 %310 }
  0x9a   :  { %v343_v39 = vpop.permute.xlu0 %342 }
  0x9b   :  { %v348_v43 = vrot.slane %v343_v39, %v347_v37 }
 0x104   :  { %v258_v50 = vpop.f32.mrf.mxu0  ;;  %v270_v51 = vpop.f32.mrf.mxu1 }
 0x105   :  { %v259_v53 = vadd.f32 %v258_v50, %v66_v47  ;;  %v271_v57 = vadd.f32 %v270_v51, %v76_v48 }
 0x106   :  { %v260_v54 = vpop.f32.mrf.mxu0  ;;  %v272_v55 = vpop.f32.mrf.mxu1 }
 0x107   :  { %v261_v56 = vadd.f32 %v260_v54, %v66_v47  ;;  %v273_v61 = vadd.f32 %v272_v55, %v76_v48  ;;  %v281_v62 = vmax.f32 %v259_v53, 0.0  ;;  %v285_v7 = vmax.f32 %v271_v57, 0.0 }
 0x108   :  { %v264_v58 = vpop.f32.mrf.mxu0  ;;  %v276_v59 = vpop.f32.mrf.mxu1  ;;  %v546_v54 = vmov 1966171168  }
 0x109   :  { %v265_v63 = vadd.f32 %v264_v58, %v71_v49  ;;  %v277_v0 = vadd.f32 %v276_v59, %v81_v52  ;;  %v282_v4 = vmax.f32 %v261_v56, 0.0  ;;  %v286_v9 = vmax.f32 %v273_v61, 0.0 }
 0x10a   :  { %v266_v1 = vpop.f32.mrf.mxu0  ;;  %v278_v2 = vpop.f32.mrf.mxu1  ;;  %v313_v11 = vmul.f32 %v296_v60, %v281_v62  ;;  %v317_v18 = vmul.f32 %v306_v14, %v285_v7  ;;  %v367_v55 = vunpack.c.l.s4 %v546_v54 }
 0x10b   :  { %v267_v5 = vadd.f32 %v266_v1, %v71_v49  ;;  %v279_v6 = vadd.f32 %v278_v2, %v81_v52  ;;  %v283_v8 = vmax.f32 %v265_v63, 0.0  ;;  %v287_v13 = vmax.f32 %v277_v0, 0.0 }
 0x10c   :  { %v314_v15 = vmul.f32 %v296_v60, %v282_v4  ;;  %v318_v21 = vmul.f32 %v306_v14, %v286_v9  ;;  %v368_v56 = vunpack.c.0.s8 %v367_v55 }
 0x10d   :  { %v284_v10 = vmax.f32 %v267_v5, 0.0  ;;  %v315_v12 = vmul.f32 %v301_v3, %v283_v8  ;;  %v288_v17 = vmax.f32 %v279_v6, 0.0  ;;  %v319_v23 = vmul.f32 %v311_v20, %v287_v13 }
 0x10e   :  { %v371_v58 = vsub.s32 %v368_v56, %v346_v32 }
 0x10f   :  { %v316_v16 = vmul.f32 %v301_v3, %v284_v10  ;;  %v321_v19 = vadd.f32 %v315_v12, %v313_v11  ;;  %v320_v25 = vmul.f32 %v311_v20, %v288_v17 }
 0x111   :  { %v330_v22 = vadd.f32 %v316_v16, %v314_v15  ;;  %v322_v24 = vadd.f32 %v321_v19, %v317_v18 }
 0x113   :  { %v331_v26 = vadd.f32 %v330_v22, %v318_v21  ;;  %v323_v28 = vadd.f32 %v322_v24, %v319_v23 }
 0x115   :  { %v332_v29 = vadd.f32 %v331_v26, %v320_v25  ;;  %v324_v30 = vrot.slane %v323_v28, 4 }
 0x117   :  { %v333_v31 = vrot.slane %v332_v29, 4  ;;  %v325_v33 = vadd.f32 %v324_v30, %v323_v28 }
 0x119   :  { %v334_v34 = vadd.f32 %v333_v31, %v332_v29  ;;  %v326_v35 = vrot.slane %v325_v33, 2 }
 0x11b   :  { %v335_v36 = vrot.slane %v334_v34, 2  ;;  %v327_v38 = vadd.f32 %v326_v35, %v325_v33 }
 0x11d   :  { %v336_v40 = vadd.f32 %v335_v36, %v334_v34  ;;  %v328_v41 = vrot.slane %v327_v38, 1 }
 0x11f   :  { %v337_v42 = vrot.slane %v336_v40, 1  ;;  %v329_v44 = vadd.f32 %v328_v41, %v327_v38 }
 0x121   :  { %v338_v45 = vadd.f32 %v337_v42, %v336_v40  ;;  %v349_v46 = vadd.f32 %v348_v43, %v329_v44 }
 0x123   :  { %v350_v47 = vadd.f32 %v348_v43, %v338_v45  ;;  %v436_v48 = vmul.f32 -1.442695, %v349_v46 }
 0x125   :  { %v437_v49 = vmul.f32 -1.442695, %v350_v47  ;;  %515 = vpow2.f32 %v436_v48 }
 0x127   :  { %517 = vpow2.f32 %v437_v49 }
 0x132   :  { %v516_v50 = vpop.eup %515 }
 0x133   :  { %v357_v52 = vadd.f32 1.0, %v516_v50 }
 0x134   :  { %v518_v51 = vpop.eup %517 }
 0x135   :  { %v358_v53 = vadd.f32 1.0, %v518_v51  ;;  %519 = vrcp.f32 %v357_v52 }
 0x137   :  { %521 = vrcp.f32 %v358_v53 }
 0x142   :  { %v520_v57 = vpop.eup %519 }
 0x144   :  { %v522_v59 = vpop.eup %521 }
 0x145   :  { %v365_v60 = vcombine.low %v520_v57, %v522_v59 }
 0x147   :  { %v372_v61 = vrot.slane %v365_v60, %v371_v58 }
 0x149   :  { %v379_v62 = vrot.slane %v372_v61, %v371_v58 }
 0x14b   :  { %385 = vst.msk [vmem:[#allocation3] sm:$0x3] %vm383_vm1, %v379_v62 }
 0x14c   :  { %534 = shalt.err (!%p531_p4)
}
 0x14d   :  { %395 = dma.vmem_to_hbm [thread:$0]  %s393_s1, 32, %s801_s5, [#allocation4]  }
 0x14e   :  { %543 = dma.done.wait [#allocation4], 32  }
 0x14f   :  { %544 = vsyncadd [#allocation4], 4294967264 }
 0x150   :  { %399 = vsyncpa [#allocation4], 1 }

</bundles_post_ra>
